<compile_context>
chip_gen: v5e
topology: v5e:2x2
jax: 0.10.0
libtpu: 0.0.40
codegen_flags: <defaults>
</compile_context>

<pallas_src>
import functools

import jax
import jax.numpy as jnp
from jax import lax
from jax.experimental import pallas as pl
from jax.experimental.pallas import tpu as pltpu


def _round_up(v, m):
    return ((v + m - 1) // m) * m


def _head_kernel(x_ref, w_ref, b_ref, o_ref, *, hw):
    # x_ref: (HW, TILE_N, C)  bf16 activations (C on lanes)
    # w_ref: (C, K_pad)       bf16 fc weight (resident across grid)
    # b_ref: (1, K_pad)       f32 padded bias (resident)
    # o_ref: (TILE_N, K_pad)  f32 padded logits
    # Global average pool: HW slab adds on the VPU, accumulated in f32.
    def body(h, acc):
        return acc + x_ref[h].astype(jnp.float32)

    acc0 = x_ref[0].astype(jnp.float32)                  # (TILE_N, C) f32
    pooled_f32 = lax.fori_loop(1, hw, body, acc0)
    pooled = (pooled_f32 * (1.0 / hw)).astype(w_ref.dtype)

    # FC: single MXU matmul with f32 accumulation, f32 bias add on the VPU.
    out = jnp.dot(pooled, w_ref[...], preferred_element_type=jnp.float32)
    o_ref[...] = out + b_ref[...]


@jax.jit
def resnet18_label_forward(x_nchw, fc_weight, fc_bias):
    """Pallas equivalent of:  fc(flatten(adaptive_avg_pool2d(x, (1,1)))).

    Args:
      x_nchw:    (N, C, H, W), C must equal fc_weight.shape[1] (512 in the module)
      fc_weight: (num_classes, C)  (PyTorch nn.Linear layout)
      fc_bias:   (num_classes,)
    Returns:
      (N, num_classes) float32
    """
    n, c, h, w = x_nchw.shape
    num_classes, c_in = fc_weight.shape
    assert c == c_in, "channel dim must match fc in_features"

    hw = h * w
    k_pad = _round_up(max(num_classes, 128), 128)        # lane-dense output, keep at 128

    # ---- wrapper-side layout prep (plain JAX glue) -------------------------
    # (N, C, H, W) -> (HW, N, C): in-kernel the pool becomes HW leading-axis
    # slab adds (pure VPU), and C=512 sits on lanes for the matmul. bf16 halves
    # HBM traffic and hits the native bf16 MXU path on v5e/v6e/v7x.
    x_hnc = jnp.transpose(x_nchw, (2, 3, 0, 1)).reshape(hw, n, c)
    x_hnc = x_hnc.astype(jnp.bfloat16)

    w_pad = jnp.pad(fc_weight.T.astype(jnp.float32),
                    ((0, 0), (0, k_pad - num_classes)))   # (C, K_pad)
    w_pad = w_pad.astype(jnp.bfloat16)
    b_pad = jnp.pad(fc_bias.astype(jnp.float32),
                    (0, k_pad - num_classes)).reshape(1, k_pad)

    # ---- tile sizing -------------------------------------------------------
    # Budget the two double-buffered x blocks (the dominant VMEM consumer) at
    # ~26 MiB; weight (512*128 bf16 = 128 KiB), bias and output blocks are
    # negligible. This fits v7x's 64 MiB (32 MiB default scoped) with headroom
    # and is far under v5e/v6e's 128 MiB.
    bf16_bytes = 2
    row_bytes = hw * c * bf16_bytes                       # one batch row of x
    budget_bytes = 26 * 1024 * 1024
    tile_n = budget_bytes // max(1, 2 * row_bytes)
    tile_n = max(8, min(256, (tile_n // 8) * 8))
    if n >= 16:
        # Ensure >= 2 grid steps so "parallel" can shard across v7x's two TCs.
        tile_n = min(tile_n, _round_up(_round_up(n, 8) // 2, 8))
    else:
        tile_n = 8

    n_pad = _round_up(n, tile_n)
    if n_pad != n:
        x_hnc = jnp.pad(x_hnc, ((0, 0), (0, n_pad - n), (0, 0)))

    grid = (n_pad // tile_n,)

    cost = pl.CostEstimate(
        flops=2 * n_pad * c * k_pad + n_pad * hw * c,     # matmul + pooling adds
        transcendentals=0,
        bytes_accessed=n_pad * hw * c * bf16_bytes        # x (bf16)
        + c * k_pad * bf16_bytes                          # weight (bf16)
        + k_pad * 4                                       # bias (f32)
        + n_pad * k_pad * 4,                              # output (f32)
    )

    kernel = functools.partial(_head_kernel, hw=hw)

    out_padded = pl.pallas_call(
        kernel,
        out_shape=jax.ShapeDtypeStruct((n_pad, k_pad), jnp.float32),
        grid=grid,
        in_specs=[
            pl.BlockSpec((hw, tile_n, c), lambda i: (0, i, 0)),  # streamed per tile
            pl.BlockSpec((c, k_pad), lambda i: (0, 0)),          # resident weight
            pl.BlockSpec((1, k_pad), lambda i: (0, 0)),          # resident bias
        ],
        out_specs=pl.BlockSpec((tile_n, k_pad), lambda i: (i, 0)),
        compiler_params=pltpu.CompilerParams(
            dimension_semantics=("parallel",),                   # shard batch over TCs
            vmem_limit_bytes=48 * 1024 * 1024,
        ),
        cost_estimate=cost,
    )(x_hnc, w_pad, b_pad)

    return out_padded[:n, :num_classes]


if __name__ == "__main__":
    key = jax.random.PRNGKey(0)
    k_x, k_w, k_b = jax.random.split(key, 3)

    # Module implies fc in_features = 512, so channels = 512. Small spatial/batch.
    N, C, H, W = 4, 512, 4, 4
    NUM_CLASSES = 10

    x = jax.random.normal(k_x, (N, C, H, W), dtype=jnp.float32)

    # Deterministic Linear init (uniform(-1/sqrt(C), 1/sqrt(C)), like PyTorch).
    bound = 1.0 / (C ** 0.5)
    fc_weight = jax.random.uniform(k_w, (NUM_CLASSES, C), dtype=jnp.float32,
                                   minval=-bound, maxval=bound)
    fc_bias = jax.random.uniform(k_b, (NUM_CLASSES,), dtype=jnp.float32,
                                 minval=-bound, maxval=bound)

    out = resnet18_label_forward(x, fc_weight, fc_bias)
    out = jax.block_until_ready(out)

    # Reference check in plain JAX (same semantics as the PyTorch module).
    # Activations/weights go through bf16 on the MXU, so compare at bf16-ish tolerance.
    ref = jnp.mean(x, axis=(2, 3)) @ fc_weight.T + fc_bias
    assert out.shape == (N, NUM_CLASSES)
    assert jnp.allclose(out, ref, atol=1e-2, rtol=1e-2)

    print("KERNEL_OK")
</pallas_src>

<mosaic_0001>
module attributes {stable_mosaic.version = 11 : i64} {
  func.func @_head_kernel(%arg0: i32, %arg1: memref<16x8x512xbf16, #tpu.memory_space<vmem>>, %arg2: memref<512x128xbf16, #tpu.memory_space<vmem>>, %arg3: memref<1x128xf32, #tpu.memory_space<vmem>>, %arg4: memref<8x128xf32, #tpu.memory_space<vmem>>) attributes {dimension_semantics = [#tpu.dimension_semantics<parallel>], iteration_bounds = array<i64: 1>, scalar_prefetch = 0 : i64, scratch_operands = 0 : i64, tpu.core_type = #tpu.core_type<tc>, window_params = [{transform_indices = @transform_0, window_bounds = array<i64: 16, 8, 512>}, {pipeline_mode = #tpu.pipeline_mode<synchronous>, transform_indices = @transform_1, window_bounds = array<i64: 512, 128>}, {pipeline_mode = #tpu.pipeline_mode<synchronous>, transform_indices = @transform_2, window_bounds = array<i64: 1, 128>}, {transform_indices = @transform_3, window_bounds = array<i64: 8, 128>}]} {
    %c0 = arith.constant 0 : index
    %c0_0 = arith.constant 0 : index
    %c0_1 = arith.constant 0 : index
    %0 = vector.load %arg1[%c0, %c0_0, %c0_1] : memref<16x8x512xbf16, #tpu.memory_space<vmem>>, vector<1x8x512xbf16>
    %1 = vector.shape_cast %0 : vector<1x8x512xbf16> to vector<8x512xbf16>
    %2 = arith.extf %1 : vector<8x512xbf16> to vector<8x512xf32>
    %c1_i32 = arith.constant 1 : i32
    %c15_i32 = arith.constant 15 : i32
    %3 = arith.addi %c1_i32, %c15_i32 : i32
    %c1_i32_2 = arith.constant 1 : i32
    %4 = scf.for %arg5 = %c1_i32 to %3 step %c1_i32_2 iter_args(%arg6 = %2) -> (vector<8x512xf32>)  : i32 {
      %14 = arith.index_cast %arg5 : i32 to index
      %c0_11 = arith.constant 0 : index
      %c0_12 = arith.constant 0 : index
      %15 = vector.load %arg1[%14, %c0_11, %c0_12] : memref<16x8x512xbf16, #tpu.memory_space<vmem>>, vector<1x8x512xbf16>
      %16 = vector.shape_cast %15 : vector<1x8x512xbf16> to vector<8x512xbf16>
      %17 = arith.extf %16 : vector<8x512xbf16> to vector<8x512xf32>
      %18 = arith.addf %arg6, %17 : vector<8x512xf32>
      scf.yield %18 : vector<8x512xf32>
    }
    %c15_i32_3 = arith.constant 15 : i32
    %cst = arith.constant 6.250000e-02 : f32
    %5 = vector.broadcast %cst : f32 to vector<8x512xf32>
    %6 = arith.mulf %4, %5 : vector<8x512xf32>
    %7 = arith.truncf %6 : vector<8x512xf32> to vector<8x512xbf16>
    %c0_4 = arith.constant 0 : index
    %c0_5 = arith.constant 0 : index
    %8 = vector.load %arg2[%c0_4, %c0_5] : memref<512x128xbf16, #tpu.memory_space<vmem>>, vector<512x128xbf16>
    %cst_6 = arith.constant dense<0.000000e+00> : vector<8x128xf32>
    %9 = tpu.matmul %7, %8, %cst_6 {dimension_numbers = #tpu.dot_dimension_numbers<[1], [0], [0], [1], [0, 0, 1, 1], [], []>} : vector<8x512xbf16>, vector<512x128xbf16>, vector<8x128xf32> -> vector<8x128xf32>
    %c0_7 = arith.constant 0 : index
    %c0_8 = arith.constant 0 : index
    %10 = vector.load %arg3[%c0_7, %c0_8] : memref<1x128xf32, #tpu.memory_space<vmem>>, vector<1x128xf32>
    %11 = vector.broadcast %10 : vector<1x128xf32> to vector<8x128xf32>
    %12 = arith.addf %9, %11 : vector<8x128xf32>
    %c0_9 = arith.constant 0 : index
    %c0_10 = arith.constant 0 : index
    %13 = vector.load %arg4[%c0_9, %c0_10] : memref<8x128xf32, #tpu.memory_space<vmem>>, vector<8x128xf32>
    tpu.vector_store %arg4[%c0_9, %c0_10], %12 {strides = array<i32>} : memref<8x128xf32, #tpu.memory_space<vmem>>, vector<8x128xf32>,
    return
  }
  func.func @transform_0(%arg0: i32) -> (i32, i32, i32) {
    %c0_i32 = arith.constant 0 : i32
    %c0_i32_0 = arith.constant 0 : i32
    %c0_i32_1 = arith.constant 0 : i32
    return %c0_i32, %arg0, %c0_i32_0 : i32, i32, i32
  }
  func.func @transform_1(%arg0: i32) -> (i32, i32) {
    %c0_i32 = arith.constant 0 : i32
    %c0_i32_0 = arith.constant 0 : i32
    %c0_i32_1 = arith.constant 0 : i32
    return %c0_i32, %c0_i32_0 : i32, i32
  }
  func.func @transform_2(%arg0: i32) -> (i32, i32) {
    %c0_i32 = arith.constant 0 : i32
    %c0_i32_0 = arith.constant 0 : i32
    %c0_i32_1 = arith.constant 0 : i32
    return %c0_i32, %c0_i32_0 : i32, i32
  }
  func.func @transform_3(%arg0: i32) -> (i32, i32) {
    %c0_i32 = arith.constant 0 : i32
    %c0_i32_0 = arith.constant 0 : i32
    return %arg0, %c0_i32 : i32, i32
  }
}

</mosaic_0001>

<bundles_post_ra>
// kernel: resnet18_label_forward.1
= control target key start
LH: loop header
LB: loop body
LE: loop exit
PB: predicated region body
PF: predicated region fallthrough
CT: control target
= control target key end

     0   :  { %s627_s16 = smov 1   ;;  %s778_s0 = inlined_call_operand.vmem [shape: bf16[16,8,512], index: 0, kind: input, shape index: {}]   ;;  %s779_s1 = inlined_call_operand.vmem [shape: bf16[512,128], index: 1, kind: input, shape index: {}]   ;;  %s780_s2 = inlined_call_operand.vmem [shape: f32[1,128], index: 2, kind: input, shape index: {}]   ;;  %s781_s3 = inlined_call_operand.vmem [shape: f32[8,128], index: 3, kind: output, shape index: {}]  }
   0x1   :  { %v14_v0 = vld [vmem:[%s778_s0] sm:$0xff]  ;;  %v15_v1 = vld [vmem:[%s778_s0 + $0x8] sm:$0xff] }
   0x2   :  { %v16_v2 = vunpack.c.l.bf16 %v14_v0   ;;  %v17_v3 = vunpack.c.h.bf16 %v14_v0   ;;  %v18_v4 = vunpack.c.l.bf16 %v15_v1   ;;  %v19_v5 = vunpack.c.h.bf16 %v15_v1  }
   0x4   :  { %v611_v6 = vmov %v19_v5   ;;  %v615_v7 = vmov %v18_v4   ;;  %v619_v8 = vmov %v17_v3   ;;  %v623_v9 = vmov %v16_v2  }
   0x5 LB: > { %s517_s17 = sshll.u32 %s629_s16, 4  ;;  %s25_s16 = sadd.s32 1, %s629_s16   ;;  %s629_s16 = sphi %s627_s16, %s25_s16   ;;  %v625_v9 = vphi %v623_v9, %v624_v9   ;;  %v621_v8 = vphi %v619_v8, %v620_v8   ;;  %v617_v7 = vphi %v615_v7, %v616_v7   ;;  %v613_v6 = vphi %v611_v6, %v612_v6  }
   0x6   : > { %s32_s20 = scalar_lea.vmem %s778_s0, %s517_s17  ;;  %p22_p0 = scmp.ge.s32.totalorder %s25_s16, 16  }
   0x7   : > { %v33_v10 = vld [vmem:[%s32_s20] sm:$0xff]  ;;  %v34_v11 = vld [vmem:[%s32_s20 + $0x8] sm:$0xff]  ;;  %v525_v20 = vld [vmem:[%s779_s1 + $0x38] sm:$0xff] (%p22_p0) }
   0x8   : > { %v35_v12 = vunpack.c.l.bf16 %v33_v10  ;;  %v36_v13 = vunpack.c.h.bf16 %v33_v10  ;;  %v37_v14 = vunpack.c.l.bf16 %v34_v11  ;;  %v38_v15 = vunpack.c.h.bf16 %v34_v11  ;;  %v533_v21 = vld [vmem:[%s779_s1 + $0x78] sm:$0xff] (%p22_p0)  ;;  %311 = vmatpush.bf16.msra.mxu0 (%p22_p0), %v525_v20  ;;  %v524_v24 = vld [vmem:[%s779_s1 + $0x30] sm:$0xff] (%p22_p0)  ;;  %v523_v28 = vld [vmem:[%s779_s1 + $0x28] sm:$0xff] (%p22_p0) }
   0x9   :  { %24 = sbr.rel (!%p22_p0) target bundleno = 5 (0x5), region = 40  ;;  %v541_v22 = vld [vmem:[%s779_s1 + $0xb8] sm:$0xff] (%p22_p0)  ;;  %324 = vmatpush.bf16.msra.mxu1 (%p22_p0), %v533_v21  ;;  %v532_v25 = vld [vmem:[%s779_s1 + $0x70] sm:$0xff] (%p22_p0)  ;;  %v531_v29 = vld [vmem:[%s779_s1 + $0x68] sm:$0xff] (%p22_p0) }
   0xa   : > { %v660_v9 = vadd.f32 %v625_v9, %v35_v12   ;;  %v662_v8 = vadd.f32 %v621_v8, %v36_v13   ;;  %v664_v7 = vadd.f32 %v617_v7, %v37_v14   ;;  %v666_v6 = vadd.f32 %v613_v6, %v38_v15   ;;  %v549_v23 = vld [vmem:[%s779_s1 + $0xf8] sm:$0xff] (%p22_p0)  ;;  %337 = vmatpush.bf16.msra.mxu2 (%p22_p0), %v541_v22  ;;  %v540_v26 = vld [vmem:[%s779_s1 + $0xb0] sm:$0xff] (%p22_p0)  ;;  %v539_v30 = vld [vmem:[%s779_s1 + $0xa8] sm:$0xff] (%p22_p0) }
   0xb   :  { %350 = vmatpush.bf16.msra.mxu3 (%p22_p0), %v549_v23  ;;  %v548_v27 = vld [vmem:[%s779_s1 + $0xf0] sm:$0xff] (%p22_p0)  ;;  %v547_v31 = vld [vmem:[%s779_s1 + $0xe8] sm:$0xff] (%p22_p0)  ;;  %v522_v32 = vld [vmem:[%s779_s1 + $0x20] sm:$0xff] (%p22_p0) }
   0xc   : > { %v782_v16 = vmov %v660_v9  ;;  %v783_v17 = vmov %v662_v8  ;;  %v784_v18 = vmov %v664_v7  ;;  %v785_v19 = vmov %v666_v6  ;;  %312 = vmatpush.bf16.msra.mxu0 (%p22_p0), %v524_v24  ;;  %v530_v33 = vld [vmem:[%s779_s1 + $0x60] sm:$0xff] (%p22_p0)  ;;  %v521_v36 = vld [vmem:[%s779_s1 + $0x18] sm:$0xff] (%p22_p0)  ;;  %v520_v40 = vld [vmem:[%s779_s1 + $0x10] sm:$0xff] (%p22_p0) }
   0xd   : > { %v612_v6 = vmov %v785_v19   ;;  %v616_v7 = vmov %v784_v18   ;;  %v620_v8 = vmov %v783_v17   ;;  %v624_v9 = vmov %v782_v16   ;;  %325 = vmatpush.bf16.msra.mxu1 (%p22_p0), %v532_v25  ;;  %v538_v34 = vld [vmem:[%s779_s1 + $0xa0] sm:$0xff] (%p22_p0)  ;;  %v529_v37 = vld [vmem:[%s779_s1 + $0x58] sm:$0xff] (%p22_p0)  ;;  %v528_v41 = vld [vmem:[%s779_s1 + $0x50] sm:$0xff] (%p22_p0) }
   0xe   :  { %338 = vmatpush.bf16.msra.mxu2 %v540_v26  ;;  %v546_v35 = vld [vmem:[%s779_s1 + $0xe0] sm:$0xff]  ;;  %v537_v38 = vld [vmem:[%s779_s1 + $0x98] sm:$0xff]  ;;  %v536_v42 = vld [vmem:[%s779_s1 + $0x90] sm:$0xff]  ;;  %v43_v48 = vmul.f32 0.0625, %v782_v16  ;;  %v44_v49 = vmul.f32 0.0625, %v783_v17  ;;  %v45_v52 = vmul.f32 0.0625, %v784_v18 }
   0xf   :  { %351 = vmatpush.bf16.msra.mxu3 %v548_v27  ;;  %v545_v39 = vld [vmem:[%s779_s1 + $0xd8] sm:$0xff]  ;;  %v544_v43 = vld [vmem:[%s779_s1 + $0xd0] sm:$0xff]  ;;  %v519_v44 = vld [vmem:[%s779_s1 + $0x8] sm:$0xff]  ;;  %v46_v53 = vmul.f32 0.0625, %v785_v19 }
  0x10   :  { %313 = vmatpush.bf16.msra.mxu0 %v523_v28  ;;  %v527_v45 = vld [vmem:[%s779_s1 + $0x48] sm:$0xff]  ;;  %v518_v50 = vld [vmem:[%s779_s1] sm:$0xff]  ;;  %v47_v56 = vpack.c.bf16 %v43_v48, %v43_v48  ;;  %v48_v57 = vpack.c.bf16 %v44_v49, %v44_v49  ;;  %v49_v58 = vpack.c.bf16 %v45_v52, %v45_v52 }
  0x11   :  { %326 = vmatpush.bf16.msra.mxu1 %v531_v29  ;;  %v535_v46 = vld [vmem:[%s779_s1 + $0x88] sm:$0xff]  ;;  %v526_v51 = vld [vmem:[%s779_s1 + $0x40] sm:$0xff]  ;;  %v50_v59 = vpack.c.bf16 %v46_v53, %v46_v53 }
  0x12   :  { %339 = vmatpush.bf16.msra.mxu2 %v539_v30  ;;  %v543_v47 = vld [vmem:[%s779_s1 + $0xc8] sm:$0xff]  ;;  %v534_v54 = vld [vmem:[%s779_s1 + $0x80] sm:$0xff] }
  0x13   :  { %352 = vmatpush.bf16.msra.mxu3 %v547_v31  ;;  %v542_v55 = vld [vmem:[%s779_s1 + $0xc0] sm:$0xff] }
  0x14   :  { %314 = vmatpush.bf16.msra.mxu0 %v522_v32  ;;  %v590_v60 = vld [vmem:[%s780_s2] ss:$0 sm:$0xff] }
  0x15   :  { %327 = vmatpush.bf16.msra.mxu1 %v530_v33 }
  0x16   :  { %340 = vmatpush.bf16.msra.mxu2 %v538_v34 }
  0x17   :  { %353 = vmatpush.bf16.msra.mxu3 %v546_v35 }
  0x18   :  { %315 = vmatpush.bf16.msra.mxu0 %v521_v36 }
  0x19   :  { %328 = vmatpush.bf16.msra.mxu1 %v529_v37 }
  0x1a   :  { %341 = vmatpush.bf16.msra.mxu2 %v537_v38 }
  0x1b   :  { %354 = vmatpush.bf16.msra.mxu3 %v545_v39 }
  0x1c   :  { %316 = vmatpush.bf16.msra.mxu0 %v520_v40 }
  0x1d   :  { %329 = vmatpush.bf16.msra.mxu1 %v528_v41 }
  0x1e   :  { %342 = vmatpush.bf16.msra.mxu2 %v536_v42 }
  0x1f   :  { %355 = vmatpush.bf16.msra.mxu3 %v544_v43 }
  0x20   :  { %317 = vmatpush.bf16.msra.mxu0 %v519_v44 }
  0x21   :  { %330 = vmatpush.bf16.msra.mxu1 %v527_v45 }
  0x22   :  { %343 = vmatpush.bf16.msra.mxu2 %v535_v46 }
  0x23   :  { %356 = vmatpush.bf16.msra.mxu3 %v543_v47 }
  0x24   :  { %318 = vmatpush.bf16.msra.mxu0 %v518_v50 }
  0x25   :  { %331 = vmatpush.bf16.msra.mxu1 %v526_v51 }
  0x26   :  { %344 = vmatpush.bf16.msra.mxu2 %v534_v54 }
  0x27   :  { %357 = vmatpush.bf16.msra.mxu3 %v542_v55  ;;  %319 = vmatmul.bf16.vlgmr.msra.gmra.mxu0 %v47_v56 }
  0x28   :  { %332 = vmatmul.bf16.vlgmr.msra.gmra.mxu1 %v48_v57 }
  0x29   :  { %345 = vmatmul.bf16.vlgmr.msra.gmra.mxu2 %v49_v58 }
  0x2a   :  { %358 = vmatmul.bf16.vlgmr.msra.gmra.mxu3 %v50_v59 }
  0xa4   :  { %v320_v61 = vpop.f32.mrf.mxu0 }
  0xa5   :  { %v333_v62 = vpop.f32.mrf.mxu1  ;;  %v321_v63 = vadd.f32 %v590_v60, %v320_v61 }
  0xa7   :  { %v334_v0 = vadd.f32 %v333_v62, %v321_v63 }
  0xac   :  { %v346_v1 = vpop.f32.mrf.mxu2  ;;  %v322_v4 = vpop.f32.mrf.mxu0 }
  0xad   :  { %v359_v2 = vpop.f32.mrf.mxu3  ;;  %v347_v3 = vadd.f32 %v346_v1, %v334_v0  ;;  %v335_v5 = vpop.f32.mrf.mxu1 }
  0xaf   :  { %v360_v6 = vadd.f32 %v359_v2, %v347_v3 }
  0xb1   :  { %363 = vst [vmem:[%s781_s3] sm:$0xff] %v360_v6 }
  0xb4   :  { %v348_v7 = vpop.f32.mrf.mxu2 }
  0xb5   :  { %v361_v8 = vpop.f32.mrf.mxu3 }

</bundles_post_ra>
